<compile_context>
chip_gen: v5e
topology: v5e:2x2
jax: 0.10.0
libtpu: 0.0.40
codegen_flags: <defaults>
</compile_context>

<pallas_src>
import jax
import jax.numpy as jnp
from jax.experimental import pallas as pl
from jax.experimental.pallas import tpu as pltpu

BN_EPS = 1e-5


def _encoder_kernel(counts_ref, x_ref, w_ref, gamma_ref, beta_ref, o_ref):
    """Fused Linear + training-mode BatchNorm1d for one encoder (node or edge).

    counts_ref : [2] int32 (SMEM, scalar-prefetch) -- valid row count per encoder
    x_ref      : [N_pad, K_pad] bf16  (zero-padded rows/cols)
    w_ref      : [K_pad, D]     bf16  (zero-padded rows)
    gamma/beta : [1, D]         f32
    o_ref      : [N_pad, D]     f32

    The Linear bias is intentionally omitted: BN mean subtraction cancels a
    per-feature bias exactly.  Padded rows are all-zero inputs (and there is no
    bias), so their y rows are exactly 0 and contribute nothing to the
    statistics sums; we divide by the true row count from SMEM.
    """
    e = pl.program_id(0)
    n = counts_ref[e].astype(jnp.float32)

    # MXU: bf16 operands, f32 accumulation.
    y = jnp.dot(x_ref[...], w_ref[...], preferred_element_type=jnp.float32)

    # One-pass batch statistics (f32).
    s1 = jnp.sum(y, axis=0, keepdims=True)
    s2 = jnp.sum(y * y, axis=0, keepdims=True)
    inv_n = 1.0 / n
    mean = s1 * inv_n
    var = s2 * inv_n - mean * mean            # biased variance (PyTorch training mode)
    inv_std = jax.lax.rsqrt(var + BN_EPS)     # EUP slot

    # Fold BN affine into one per-element FMA: y * scale + shift.
    scale = inv_std * gamma_ref[...]          # [1, D]
    shift = beta_ref[...] - mean * scale      # [1, D]
    o_ref[...] = (y * scale + shift).astype(o_ref.dtype)


def _round_up(x, m):
    return (x + m - 1) // m * m


def feature_encoder_forward(batch, params):
    """FeatureEncoder.forward: node and edge Linear+BN fused in ONE pallas_call."""
    x, edge_attr = batch["x"], batch["edge_attr"]
    n_node, k_node = x.shape
    n_edge, k_edge = edge_attr.shape
    d_out = params["node_w"].shape[1]
    assert params["edge_w"].shape[1] == d_out

    n_pad = _round_up(max(n_node, n_edge), 8)
    k_pad = max(k_node, k_edge)

    def pad2(a, rows, cols):
        return jnp.pad(a, ((0, rows - a.shape[0]), (0, cols - a.shape[1])))

    # Stack the node/edge problems along a leading size-2 axis.  Matmul
    # operands go in bf16; BN parameters stay f32.  The Linear biases are NOT
    # passed: BN cancels them (see kernel docstring).
    x_st = jnp.stack([pad2(x, n_pad, k_pad),
                      pad2(edge_attr, n_pad, k_pad)]).astype(jnp.bfloat16)
    w_st = jnp.stack([pad2(params["node_w"], k_pad, d_out),
                      pad2(params["edge_w"], k_pad, d_out)]).astype(jnp.bfloat16)
    gamma_st = jnp.stack([params["node_gamma"], params["edge_gamma"]])   # [2,1,D] f32
    beta_st = jnp.stack([params["node_beta"], params["edge_beta"]])      # [2,1,D] f32
    counts = jnp.array([n_node, n_edge], dtype=jnp.int32)

    cost = pl.CostEstimate(
        flops=2 * 2 * n_pad * k_pad * d_out,
        transcendentals=2 * d_out,
        bytes_accessed=int(x_st.size * 2 + w_st.size * 2
                           + gamma_st.size * 4 + beta_st.size * 4
                           + 2 * n_pad * d_out * 4),
    )

    out = pl.pallas_call(
        _encoder_kernel,
        out_shape=jax.ShapeDtypeStruct((2, n_pad, d_out), jnp.float32),
        grid_spec=pltpu.PrefetchScalarGridSpec(
            num_scalar_prefetch=1,
            grid=(2,),
            in_specs=[
                pl.BlockSpec((None, n_pad, k_pad), lambda e, c: (e, 0, 0)),
                pl.BlockSpec((None, k_pad, d_out), lambda e, c: (e, 0, 0)),
                pl.BlockSpec((None, 1, d_out), lambda e, c: (e, 0, 0)),
                pl.BlockSpec((None, 1, d_out), lambda e, c: (e, 0, 0)),
            ],
            out_specs=pl.BlockSpec((None, n_pad, d_out), lambda e, c: (e, 0, 0)),
        ),
        compiler_params=pltpu.CompilerParams(
            dimension_semantics=("parallel",)),
        cost_estimate=cost,
    )(counts, x_st, w_st, gamma_st, beta_st)

    result = dict(batch)
    result["x"] = out[0, :n_node]
    result["edge_attr"] = out[1, :n_edge]
    return result


def _reference_encode(x, w, b, gamma, beta, *, bf16_operands):
    """Pure-JAX reference: Linear (WITH bias) + training-mode BatchNorm1d."""
    xc = x.astype(jnp.bfloat16).astype(jnp.float32) if bf16_operands else x
    wc = w.astype(jnp.bfloat16).astype(jnp.float32) if bf16_operands else w
    y = xc @ wc + b
    mean = jnp.mean(y, axis=0, keepdims=True)
    var = jnp.mean((y - mean) ** 2, axis=0, keepdims=True)
    return (y - mean) * jax.lax.rsqrt(var + BN_EPS) * gamma + beta


if __name__ == "__main__":
    key = jax.random.PRNGKey(0)
    # GraphGPS-style config: cfg.gnn.dim_inner = cfg.gnn.dim_edge = 128
    # (128 -> lane-dense output stores).
    num_nodes, num_edges = 32, 48
    node_dim_in, edge_dim_in, dim_inner = 16, 8, 128

    k = jax.random.split(key, 8)
    x = jax.random.normal(k[0], (num_nodes, node_dim_in), dtype=jnp.float32)
    edge_attr = jax.random.normal(k[1], (num_edges, edge_dim_in), dtype=jnp.float32)
    batch = {"x": x, "edge_attr": edge_attr}

    def lin_init(kk, d_in, d_out):
        bound = 1.0 / jnp.sqrt(d_in)
        kw, kb = jax.random.split(kk)
        w = jax.random.uniform(kw, (d_in, d_out), minval=-bound, maxval=bound,
                               dtype=jnp.float32)
        b = jax.random.uniform(kb, (1, d_out), minval=-bound, maxval=bound,
                               dtype=jnp.float32)
        return w, b

    node_w, node_b = lin_init(k[2], node_dim_in, dim_inner)
    edge_w, edge_b = lin_init(k[3], edge_dim_in, dim_inner)
    params = {
        "node_w": node_w, "node_b": node_b,
        "node_gamma": (1.0 + 0.1 * jax.random.normal(k[4], (1, dim_inner))
                       ).astype(jnp.float32),
        "node_beta": (0.1 * jax.random.normal(k[5], (1, dim_inner))
                      ).astype(jnp.float32),
        "edge_w": edge_w, "edge_b": edge_b,
        "edge_gamma": (1.0 + 0.1 * jax.random.normal(k[6], (1, dim_inner))
                       ).astype(jnp.float32),
        "edge_beta": (0.1 * jax.random.normal(k[7], (1, dim_inner))
                      ).astype(jnp.float32),
    }

    out = feature_encoder_forward(batch, params)
    jax.block_until_ready(out)

    # Strict check: same mixed precision as the kernel (bf16 matmul operands,
    # f32 everything else).  Bias IS included in the reference -> proves the
    # in-kernel bias elision is exact under BN.
    ref_x = _reference_encode(x, node_w, node_b,
                              params["node_gamma"], params["node_beta"],
                              bf16_operands=True)
    ref_e = _reference_encode(edge_attr, edge_w, edge_b,
                              params["edge_gamma"], params["edge_beta"],
                              bf16_operands=True)
    assert jnp.allclose(out["x"], ref_x, atol=2e-4, rtol=2e-4)
    assert jnp.allclose(out["edge_attr"], ref_e, atol=2e-4, rtol=2e-4)

    # Loose check against the exact PyTorch-precision (f32 matmul) reference:
    # only bf16 operand quantization separates them.
    ref_x_f32 = _reference_encode(x, node_w, node_b,
                                  params["node_gamma"], params["node_beta"],
                                  bf16_operands=False)
    ref_e_f32 = _reference_encode(edge_attr, edge_w, edge_b,
                                  params["edge_gamma"], params["edge_beta"],
                                  bf16_operands=False)
    assert jnp.allclose(out["x"], ref_x_f32, atol=5e-2)
    assert jnp.allclose(out["edge_attr"], ref_e_f32, atol=5e-2)

    assert out["x"].shape == (num_nodes, dim_inner)
    assert out["edge_attr"].shape == (num_edges, dim_inner)

    print("KERNEL_OK")
</pallas_src>

<mosaic_0001>
module attributes {stable_mosaic.version = 11 : i64} {
  func.func @_encoder_kernel(%arg0: i32, %arg1: memref<2xi32, #tpu.memory_space<smem>>, %arg2: memref<1x48x16xbf16, #tpu.memory_space<vmem>>, %arg3: memref<1x16x128xbf16, #tpu.memory_space<vmem>>, %arg4: memref<1x1x128xf32, #tpu.memory_space<vmem>>, %arg5: memref<1x1x128xf32, #tpu.memory_space<vmem>>, %arg6: memref<1x48x128xf32, #tpu.memory_space<vmem>>) attributes {dimension_semantics = [#tpu.dimension_semantics<parallel>], iteration_bounds = array<i64: 2>, scalar_prefetch = 1 : i64, scratch_operands = 0 : i64, tpu.core_type = #tpu.core_type<tc>, window_params = [{transform_indices = @transform_0, window_bounds = array<i64: 1, 48, 16>}, {transform_indices = @transform_1, window_bounds = array<i64: 1, 16, 128>}, {transform_indices = @transform_2, window_bounds = array<i64: 1, 1, 128>}, {transform_indices = @transform_3, window_bounds = array<i64: 1, 1, 128>}, {transform_indices = @transform_4, window_bounds = array<i64: 1, 48, 128>}]} {
    %0 = arith.index_cast %arg0 : i32 to index
    %1 = memref.load %arg1[%0] : memref<2xi32, #tpu.memory_space<smem>>
    %2 = arith.sitofp %1 : i32 to f32
    %c0 = arith.constant 0 : index
    %c0_0 = arith.constant 0 : index
    %c0_1 = arith.constant 0 : index
    %3 = vector.load %arg2[%c0, %c0_0, %c0_1] : memref<1x48x16xbf16, #tpu.memory_space<vmem>>, vector<1x48x16xbf16>
    %4 = vector.shape_cast %3 : vector<1x48x16xbf16> to vector<48x16xbf16>
    %c0_2 = arith.constant 0 : index
    %c0_3 = arith.constant 0 : index
    %c0_4 = arith.constant 0 : index
    %5 = vector.load %arg3[%c0_2, %c0_3, %c0_4] : memref<1x16x128xbf16, #tpu.memory_space<vmem>>, vector<1x16x128xbf16>
    %6 = vector.shape_cast %5 : vector<1x16x128xbf16> to vector<16x128xbf16>
    %cst = arith.constant dense<0.000000e+00> : vector<48x128xf32>
    %7 = tpu.matmul %4, %6, %cst {dimension_numbers = #tpu.dot_dimension_numbers<[1], [0], [0], [1], [0, 0, 1, 1], [], []>} : vector<48x16xbf16>, vector<16x128xbf16>, vector<48x128xf32> -> vector<48x128xf32>
    %cst_5 = arith.constant dense<0.000000e+00> : vector<128xf32>
    %8 = vector.multi_reduction <add>, %7, %cst_5 [0] : vector<48x128xf32> to vector<128xf32>
    %9 = vector.shape_cast %8 : vector<128xf32> to vector<1x128xf32>
    %10 = arith.mulf %7, %7 : vector<48x128xf32>
    %cst_6 = arith.constant dense<0.000000e+00> : vector<128xf32>
    %11 = vector.multi_reduction <add>, %10, %cst_6 [0] : vector<48x128xf32> to vector<128xf32>
    %12 = vector.shape_cast %11 : vector<128xf32> to vector<1x128xf32>
    %cst_7 = arith.constant 1.000000e+00 : f32
    %13 = arith.divf %cst_7, %2 : f32
    %14 = vector.broadcast %13 : f32 to vector<1x128xf32>
    %15 = arith.mulf %9, %14 : vector<1x128xf32>
    %16 = vector.broadcast %13 : f32 to vector<1x128xf32>
    %17 = arith.mulf %12, %16 : vector<1x128xf32>
    %18 = arith.mulf %15, %15 : vector<1x128xf32>
    %19 = arith.subf %17, %18 : vector<1x128xf32>
    %cst_8 = arith.constant 9.99999974E-6 : f32
    %20 = vector.broadcast %cst_8 : f32 to vector<1x128xf32>
    %21 = arith.addf %19, %20 : vector<1x128xf32>
    %22 = math.rsqrt %21 : vector<1x128xf32>
    %c0_9 = arith.constant 0 : index
    %c0_10 = arith.constant 0 : index
    %c0_11 = arith.constant 0 : index
    %23 = vector.load %arg4[%c0_9, %c0_10, %c0_11] : memref<1x1x128xf32, #tpu.memory_space<vmem>>, vector<1x1x128xf32>
    %24 = vector.shape_cast %23 : vector<1x1x128xf32> to vector<1x128xf32>
    %25 = arith.mulf %22, %24 : vector<1x128xf32>
    %c0_12 = arith.constant 0 : index
    %c0_13 = arith.constant 0 : index
    %c0_14 = arith.constant 0 : index
    %26 = vector.load %arg5[%c0_12, %c0_13, %c0_14] : memref<1x1x128xf32, #tpu.memory_space<vmem>>, vector<1x1x128xf32>
    %27 = vector.shape_cast %26 : vector<1x1x128xf32> to vector<1x128xf32>
    %28 = arith.mulf %15, %25 : vector<1x128xf32>
    %29 = arith.subf %27, %28 : vector<1x128xf32>
    %30 = vector.broadcast %25 : vector<1x128xf32> to vector<48x128xf32>
    %31 = arith.mulf %7, %30 : vector<48x128xf32>
    %32 = vector.broadcast %29 : vector<1x128xf32> to vector<48x128xf32>
    %33 = arith.addf %31, %32 : vector<48x128xf32>
    %c0_15 = arith.constant 0 : index
    %c0_16 = arith.constant 0 : index
    %c0_17 = arith.constant 0 : index
    %34 = vector.load %arg6[%c0_15, %c0_16, %c0_17] : memref<1x48x128xf32, #tpu.memory_space<vmem>>, vector<1x48x128xf32>
    %35 = vector.shape_cast %34 : vector<1x48x128xf32> to vector<48x128xf32>
    %36 = vector.shape_cast %33 : vector<48x128xf32> to vector<1x48x128xf32>
    tpu.vector_store %arg6[%c0_15, %c0_16, %c0_17], %36 {strides = array<i32>} : memref<1x48x128xf32, #tpu.memory_space<vmem>>, vector<1x48x128xf32>,
    return
  }
  func.func @transform_0(%arg0: i32, %arg1: memref<2xi32, #tpu.memory_space<smem>>) -> (i32, i32, i32) {
    %c0_i32 = arith.constant 0 : i32
    %c0_i32_0 = arith.constant 0 : i32
    %c0_i32_1 = arith.constant 0 : i32
    return %arg0, %c0_i32, %c0_i32_0 : i32, i32, i32
  }
  func.func @transform_1(%arg0: i32, %arg1: memref<2xi32, #tpu.memory_space<smem>>) -> (i32, i32, i32) {
    %c0_i32 = arith.constant 0 : i32
    %c0_i32_0 = arith.constant 0 : i32
    %c0_i32_1 = arith.constant 0 : i32
    return %arg0, %c0_i32, %c0_i32_0 : i32, i32, i32
  }
  func.func @transform_2(%arg0: i32, %arg1: memref<2xi32, #tpu.memory_space<smem>>) -> (i32, i32, i32) {
    %c0_i32 = arith.constant 0 : i32
    %c0_i32_0 = arith.constant 0 : i32
    %c0_i32_1 = arith.constant 0 : i32
    return %arg0, %c0_i32, %c0_i32_0 : i32, i32, i32
  }
  func.func @transform_3(%arg0: i32, %arg1: memref<2xi32, #tpu.memory_space<smem>>) -> (i32, i32, i32) {
    %c0_i32 = arith.constant 0 : i32
    %c0_i32_0 = arith.constant 0 : i32
    %c0_i32_1 = arith.constant 0 : i32
    return %arg0, %c0_i32, %c0_i32_0 : i32, i32, i32
  }
  func.func @transform_4(%arg0: i32, %arg1: memref<2xi32, #tpu.memory_space<smem>>) -> (i32, i32, i32) {
    %c0_i32 = arith.constant 0 : i32
    %c0_i32_0 = arith.constant 0 : i32
    %c0_i32_1 = arith.constant 0 : i32
    return %arg0, %c0_i32, %c0_i32_0 : i32, i32, i32
  }
}

</mosaic_0001>

<bundles_post_ra>
// kernel: tpu_custom_call.1
= control target key start
LH: loop header
LB: loop body
LE: loop exit
PB: predicated region body
PF: predicated region fallthrough
CT: control target
= control target key end

     0   :  { %s679_s21 = smov [#allocation3]   ;;  %s838_s0 = inlined_call_operand.vmem [shape: s32[2], index: 0, kind: input, shape index: {}]   ;;  %s839_s1 = inlined_call_operand.vmem [shape: bf16[2,48,16], index: 1, kind: input, shape index: {}]   ;;  %s840_s2 = inlined_call_operand.vmem [shape: bf16[2,16,128], index: 2, kind: input, shape index: {}]   ;;  %s841_s3 = inlined_call_operand.vmem [shape: f32[2,1,128], index: 3, kind: input, shape index: {}]   ;;  %s842_s4 = inlined_call_operand.vmem [shape: f32[2,1,128], index: 4, kind: input, shape index: {}]   ;;  %s843_s5 = inlined_call_operand.hbm [shape: f32[2,48,128], index: 5, kind: output, shape index: {}]  }
   0x1   :  { %s11_s20 = sshll.u32 %s838_s0, 4  ;;  %s12_s20 = int_to_ptr.vmem [resolvable:$true] %s11_s20 }
   0x2   :  { %14 = dma.vmem_to_smem %s12_s20, 16, %s679_s21, [#allocation2] }
   0x3   :  { %657 = dma.done.wait [#allocation2], 16 }
   0x4   :  { %658 = vsyncadd [#allocation2], 4294967280 }
   0x5   :  { %17 = sfence }
   0x6   :  { %18 = vsyncpa [#allocation5], 0 }
   0x7   :  { %20 = vsyncpa [#allocation5 + $0x1], 0  ;;  %s715_s22 = smov 0   ;;  %s717_s23 = smov 0  }
   0x8   :  { %s719_s24 = smov 0   ;;  %s721_s25 = smov 0  }
   0x9 LB: > { %s736_s0 = sadd.s32 4294967295, %s677_s25   ;;  %s514_s26 = sadd.s32 4294967294, %s677_s25   ;;  %s677_s25 = sphi %s721_s25, %s849_s25   ;;  %s673_s24 = sphi %s719_s24, %s848_s24   ;;  %s669_s23 = sphi %s717_s23, %s847_s23   ;;  %s665_s22 = sphi %s715_s22, %s846_s22  }
   0xa   : > { %s740_s27 = sadd.s32 1, %s677_s25   ;;  %s137_s28 = sadd.s32 1, %s673_s24 }
   0xb   : > { %s134_s29 = ssub.s32 %s677_s25, %s740_s27  ;;  %p147_p0 = scmp.ne.s32.totalorder %s673_s24, %s669_s23 }
   0xc   : > { %p135_p1 = scmp.eq.s32.totalorder %s134_s29, 0  ;;  %p148_p2 = scmp.eq.s32.totalorder %s736_s0, 1 }
   0xd   : > { %p153_p3 = scmp.ne.s32.totalorder %s669_s23, %s665_s22  ;;  %p154_p4 = scmp.eq.s32.totalorder %s514_s26, 1 }
   0xe   : > { %s751_s30 = scalar_select %p135_p1, %s673_s24, %s137_s28  }
   0xf   : > { %p753_p5 = por %p148_p2, %p147_p0  ;;  %p757_p6 = por %p154_p4, %p153_p3 }
  0x10   : > { %p517_p7 = scmp.ge.s32.totalorder %s677_s25, 1  ;;  %p200_p8 = scmp.lt.s32.totalorder %s677_s25, 3 }
  0x12   : > { %p201_p9 = pnand %p517_p7, %p200_p8 }
  0x13   : > { %p237_p10 = scmp.lt.s32.totalorder (!%p201_p9), %s736_s0, 1  ;;  %s254_s8 = sld [smem:[#allocation3 + %s736_s0]] (!%p201_p9) }
  0x14   : > { %204 = sbr.rel (%p201_p9) target bundleno = 234 (0xea), region = 36  ;;  %s234_s28 = sand.u32 (!%p201_p9), 1, %s669_s23  }
  0x15   : > { %s554_s12 = smul.u32 (!%p201_p9), 48, %s736_s0 }
  0x19   : > { %s766_s9 = scalar_select %p237_p10, %s736_s0, 1  ;;  %vm285_vm0 = vcmask 130048  }
  0x1a   : > { %s255_s18 = scvt.s32.f32 %s254_s8 }
  0x1b   : > { %s543_s10 = sshll.u32 %s766_s9, 3  ;;  %s551_s11 = smul.u32 24, %s766_s9 }
  0x1c   : > { %s246_s14 = scalar_lea.vmem %s840_s2, %s543_s10  ;;  %v347_v4 = vstv %s255_s18  ;;  %s249_s26 = scalar_lea.vmem %s841_s3, %s766_s9 }
  0x1d   : > { %v547_v0 = vld [vmem:[%s246_s14] sm:$0xff]  ;;  %s241_s17 = scalar_lea.vmem %s839_s1, %s551_s11  ;;  %597 = vrcp.f32 %v347_v4  ;;  %v359_v7 = vand.u32 2147483648, %v347_v4  ;;  %vm353_vm1 = vweird.f32 %v347_v4  ;;  %v357_v9 = vand.u32 2147483647, %v347_v4  ;;  %s252_s10 = scalar_lea.vmem %s842_s4, %s766_s9 }
  0x1e   : > { %v544_v1 = vld [vmem:[%s241_s17] sm:$0xff]  ;;  %v545_v2 = vld [vmem:[%s241_s17 + $0x8] sm:$0xff]  ;;  %302 = vmatpush.bf16.msra.mxu0 %v547_v0  ;;  %548 = vmatpush.bf16.msra.mxu1 %v547_v0  ;;  %v546_v3 = vld [vmem:[%s241_s17 + $0x10] sm:$0xff]  ;;  %s550_s11 = smul.u32 48, %s234_s28  ;;  %s418_s9 = scalar_lea.hbm %s843_s5, %s554_s12 }
  0x1f   : > { %549 = vmatpush.bf16.msra.mxu2 %v547_v0  ;;  %v360_v11 = vor.u32 1.1754944e-38, %v359_v7  ;;  %vm358_vm4 = vcmp.eq.f32.partialorder %v357_v9, 8.507059e+37  ;;  %v379_v61 = vld [vmem:[%s249_s26] sm:$0x1]  ;;  %s421_s16 = sshll.u32 %s418_s9, 4  ;;  %s407_s17 = scalar_lea.sflag [#allocation5], %s234_s28  ;;  %s422_s16 = int_to_ptr.hbm [resolvable:$true] %s421_s16 }
  0x20   : > { %v381_v0 = vld [vmem:[%s252_s10] sm:$0x1]  ;;  %s236_s0 = scalar_lea.vmem [#allocation4], %s550_s11  ;;  %s627_s18 = sshra.s32 %s422_s16, 4  ;;  %s628_s18 = int_to_ptr.hbm [resolvable:$true] %s627_s18 }
  0x21   : > { %537 = vmatmul.msk.bf16.vlgmr.msra.gmra.mxu0 %vm285_vm0, %v544_v1  ;;  %538 = vmatmul.msk.bf16.vlgmr.msra.gmra.mxu1 %vm285_vm0, %v545_v2  ;;  %s419_s15 = sshll.u32 %s236_s0, 4  ;;  %s633_s26 = scalar_lea.hbm %s843_s5, 96  ;;  %s420_s15 = int_to_ptr.vmem [resolvable:$true] %s419_s15 }
  0x22   : > { %539 = vmatmul.msk.bf16.vlgmr.msra.gmra.mxu2 %vm285_vm0, %v546_v3  ;;  %p634_p0 = scmp.lt.s32.totalorder %s628_s18, %s843_s5 }
  0x23   : > { %v598_v5 = vpop.eup %597 }
  0x24   : > { %v349_v6 = vmul.f32 %v598_v5, %v347_v4  ;;  %vm354_vm2 = vweird.f32 %v598_v5 }
  0x25   : > { %vm355_vm3 = vmor %vm353_vm1, %vm354_vm2 }
  0x26   : > { %v350_v8 = vsub.f32 1.0, %v349_v6 }
  0x28   : > { %v351_v10 = vmul.f32 %v598_v5, %v350_v8 }
  0x2a   : > { %v352_v12 = vadd.f32 %v598_v5, %v351_v10 }
  0x2c   : > { %v356_v13 = vsel %vm355_vm3, %v598_v5, %v352_v12 }
  0x2d   : > { %v361_v14 = vsel %vm358_vm4, %v360_v11, %v356_v13 }
  0x2e   : > { %552 = vpush %v361_v14 }
  0x5f   : > { %s553_s19 = spop %552 }
  0x60   : > { %v363_v46 = vstv %s553_s19  ;;  %s629_s19 = scalar_lea.hbm %s628_s18, 48 }
  0x61   : > { %p630_p11 = scmp.ne.s32.totalorder %s628_s18, %s629_s19  ;;  %p635_p1 = scmp.lt.s32.totalorder %s633_s26, %s629_s19 }
  0x63   : > { %p631_p12 = pnand %p630_p11, %p753_p5  ;;  %p636_p2 = por %p635_p1, %p634_p0 }
  0x65   : > { %p632_p13 = pneg %p631_p12 }
  0x67   : > { %p637_p3 = pnand %p636_p2, %p632_p13 }
  0x9e   : > { %v776_v15 = vpop.f32.mrf.mxu0  ;;  %v778_v16 = vpop.f32.mrf.mxu1 }
  0x9f   : > { %v330_v19 = vmul.f32 %v776_v15, %v776_v15  ;;  %v332_v23 = vmul.f32 %v778_v16, %v778_v16 }
  0xa5   : > { %v780_v17 = vpop.f32.mrf.mxu2 }
  0xa6   : > { %v306_v18 = vpop.f32.mrf.mxu0  ;;  %v311_v22 = vpop.f32.mrf.mxu1  ;;  %v334_v29 = vmul.f32 %v780_v17, %v780_v17 }
  0xa7   : > { %v319_v20 = vadd.f32 %v306_v18, %v776_v15  ;;  %v331_v21 = vmul.f32 %v306_v18, %v306_v18  ;;  %v333_v27 = vmul.f32 %v311_v22, %v311_v22 }
  0xa9   : > { %v336_v24 = vadd.f32 %v331_v21, %v330_v19  ;;  %v320_v25 = vadd.f32 %v319_v20, %v778_v16 }
  0xab   : > { %v321_v26 = vadd.f32 %v320_v25, %v311_v22  ;;  %v337_v28 = vadd.f32 %v336_v24, %v332_v23 }
  0xad   : > { %v338_v30 = vadd.f32 %v337_v28, %v333_v27  ;;  %v316_v31 = vpop.f32.mrf.mxu2  ;;  %v322_v32 = vadd.f32 %v321_v26, %v780_v17 }
  0xae   : > { %v335_v34 = vmul.f32 %v316_v31, %v316_v31 }
  0xaf   : > { %v323_v33 = vadd.f32 %v322_v32, %v316_v31  ;;  %v339_v35 = vadd.f32 %v338_v30, %v334_v29 }
  0xb1   : > { %v324_v36 = vrot.slane %v323_v33, 4  ;;  %v340_v37 = vadd.f32 %v339_v35, %v335_v34 }
  0xb3   : > { %v325_v38 = vadd.f32 %v324_v36, %v323_v33  ;;  %v341_v39 = vrot.slane %v340_v37, 4 }
  0xb5   : > { %v326_v40 = vrot.slane %v325_v38, 2  ;;  %v342_v41 = vadd.f32 %v341_v39, %v340_v37 }
  0xb7   : > { %v327_v42 = vadd.f32 %v326_v40, %v325_v38  ;;  %v343_v43 = vrot.slane %v342_v41, 2 }
  0xb9   : > { %v328_v44 = vrot.slane %v327_v42, 1  ;;  %v344_v45 = vadd.f32 %v343_v43, %v342_v41 }
  0xbb   : > { %v329_v47 = vadd.f32 %v328_v44, %v327_v42  ;;  %v345_v48 = vrot.slane %v344_v45, 1 }
  0xbd   : > { %v346_v49 = vadd.f32 %v345_v48, %v344_v45  ;;  %v364_v50 = vmul.f32 %v363_v46, %v329_v47 }
  0xbf   : > { %v365_v51 = vmul.f32 %v363_v46, %v346_v49  ;;  %v366_v52 = vmul.f32 %v364_v50, %v364_v50 }
  0xc1   : > { %v367_v53 = vsub.f32 %v365_v51, %v366_v52 }
  0xc3   : > { %v368_v54 = vadd.f32 1e-05, %v367_v53 }
  0xc5   : > { %599 = vrsqrt.f32 %v368_v54  ;;  %vm375_vm6 = vweird.f32 %v368_v54 }
  0xcb   : > { %v600_v55 = vpop.eup %599 }
  0xcc   : > { %v370_v56 = vmul.f32 %v600_v55, %v368_v54  ;;  %vm376_vm5 = vweird.f32 %v600_v55 }
  0xcd   : > { %vm377_vm7 = vmor %vm375_vm6, %vm376_vm5 }
  0xce   : > { %v371_v57 = vmul.f32 %v600_v55, %v370_v56 }
  0xd0   : > { %v372_v58 = vmul.f32 0.5, %v371_v57 }
  0xd2   : > { %v373_v59 = vsub.f32 1.5, %v372_v58 }
  0xd4   : > { %v374_v60 = vmul.f32 %v600_v55, %v373_v59 }
  0xd6   : > { %v378_v62 = vsel %vm377_vm7, %v600_v55, %v374_v60 }
  0xd7   : > { %v380_v63 = vmul.f32 %v379_v61, %v378_v62 }
  0xd9   : > { %v382_v1 = vmul.f32 %v380_v63, %v364_v50  ;;  %v384_v2 = vperm.slane %v380_v63, 0 }
  0xdb   : > { %v383_v3 = vsub.f32 %v381_v0, %v382_v1  ;;  %v385_v4 = vmul.f32 %v384_v2, %v776_v15  ;;  %v386_v5 = vmul.f32 %v384_v2, %v306_v18  ;;  %v387_v6 = vmul.f32 %v384_v2, %v778_v16 }
  0xdc   : > { %v388_v8 = vmul.f32 %v384_v2, %v311_v22  ;;  %v389_v9 = vmul.f32 %v384_v2, %v780_v17  ;;  %v390_v13 = vmul.f32 %v384_v2, %v316_v31 }
  0xdd   : > { %v392_v7 = vperm.slane %v383_v3, 0 }
  0xdf   : > { %v394_v10 = vadd.f32 %v392_v7, %v385_v4  ;;  %v395_v11 = vadd.f32 %v392_v7, %v386_v5  ;;  %v396_v12 = vadd.f32 %v392_v7, %v387_v6  ;;  %v397_v14 = vadd.f32 %v392_v7, %v388_v8 }
  0xe0   : > { %v398_v15 = vadd.f32 %v392_v7, %v389_v9  ;;  %v399_v16 = vadd.f32 %v392_v7, %v390_v13 }
  0xe1   : > { %400 = vst [vmem:[%s236_s0] sm:$0xff] %v394_v10 }
  0xe2   : > { %401 = vst [vmem:[%s236_s0 + $0x8] sm:$0xff] %v395_v11 }
  0xe3   : > { %402 = vst [vmem:[%s236_s0 + $0x10] sm:$0xff] %v396_v12 }
  0xe4   : > { %403 = vst [vmem:[%s236_s0 + $0x18] sm:$0xff] %v397_v14 }
  0xe5   : > { %404 = vst [vmem:[%s236_s0 + $0x20] sm:$0xff] %v398_v15 }
  0xe6   : > { %405 = vst [vmem:[%s236_s0 + $0x28] sm:$0xff] %v399_v16 }
  0xe7   : > { %640 = shalt.err (!%p637_p3)
}
  0xe8   : > { %s680_s28 = smov 128   ;;  %s681_s10 = smov 8  }
  0xe9   : > { %555 = dma.vmem_to_hbm [thread:$0]  (%p753_p5), %s420_s15, 768, %s422_s16, %s407_s17, %s680_s28, %s680_s28, %s681_s10  }
  0xea PF: > { %p561_p4 = scmp.ge.s32.totalorder %s677_s25, 2  ;;  %s436_s11 = sand.u32 1, %s665_s22  }
  0xeb   : > { %s437_s12 = scalar_lea.sflag [#allocation5], %s436_s11 }
  0xec   : > { %p558_p7 = pnand %p561_p4, %p757_p6 }
  0xee   : > { %p559_p8 = pneg %p558_p7 }
  0xf0   : > { %660 = dma.done.wait (%p559_p8), %s437_s12, 768  }
  0xf1   : > { %662 = vsyncadd (%p559_p8), %s437_s12, 4294966528  ;;  %p23_p9 = scmp.ge.s32.totalorder %s740_s27, 4   ;;  %s846_s22 = smov %s669_s23 }
  0xf2   : > { %s847_s23 = smov %s673_s24  ;;  %s848_s24 = smov %s751_s30 }
  0xf3   : > { %s849_s25 = smov %s740_s27  ;;  %25 = sbr.rel (!%p23_p9) target bundleno = 9 (0x9), region = 80 }
  0xf8   :  { %443 = vsyncpa [#allocation5], 1 }
  0xf9   :  { %445 = vsyncpa [#allocation5 + $0x1], 1 }

</bundles_post_ra>
